<compile_context>
chip_gen: v7x
topology: tpu7x:2x2x1
jax: 0.10.0
libtpu: 0.0.40
codegen_flags: <defaults>
</compile_context>

<pallas_src>
import functools

import jax
import jax.numpy as jnp
from jax.experimental import pallas as pl
from jax.experimental.pallas import tpu as pltpu


def _mha_kernel(num_heads, head_dim,
                x_ref, w_qkv_ref, b_qkv_ref, wo_ref, bo_ref, o_ref):
    f32 = jnp.float32
    H, D = num_heads, head_dim

    x = x_ref[...]                                   # (N, C)
    N, C = x.shape

    # Head-batched fused QKV projection (fc_in already folded in on the host).
    # Canonical batched dot_general: batch dim leading, contraction on the last
    # dim of both operands -> feeds the MXU directly, no transposes.
    x_b = jnp.broadcast_to(x[None, :, :], (H, N, C))
    qkv = jax.lax.dot_general(
        x_b, w_qkv_ref[...],
        dimension_numbers=(((2,), (2,)), ((0,), (0,))),
        preferred_element_type=f32) + b_qkv_ref[...]            # (H, N, 3D)

    q = qkv[:, :, 0 * D:1 * D]                                   # (H, N, D)
    k = qkv[:, :, 1 * D:2 * D]                                   # (H, N, D)
    v = qkv[:, :, 2 * D:3 * D]                                   # (H, N, D)

    # Scaled dot-product attention, batched over heads.
    scale = 1.0 / jnp.sqrt(jnp.asarray(D, f32))
    s = jax.lax.dot_general(
        q, k, dimension_numbers=(((2,), (2,)), ((0,), (0,))),
        preferred_element_type=f32) * scale                      # (H, N, N)
    s = s - jnp.max(s, axis=-1, keepdims=True)
    p = jnp.exp(s)
    p = p * pl.reciprocal(jnp.sum(p, axis=-1, keepdims=True), approx=True)
    o_h = jax.lax.dot_general(
        p, v, dimension_numbers=(((2,), (1,)), ((0,), (0,))),
        preferred_element_type=f32)                              # (H, N, D)

    # fc_out applied per head (weights head-major on host), then reduce heads:
    #   out[n, o] = sum_h o_h[h, n, :] . Wo[o, h*D:(h+1)*D]  + bo[o]
    out_h = jax.lax.dot_general(
        o_h, wo_ref[...],
        dimension_numbers=(((2,), (2,)), ((0,), (0,))),
        preferred_element_type=f32)                              # (H, N, C_out)
    o_ref[...] = (jnp.sum(out_h, axis=0) + bo_ref[...]).astype(o_ref.dtype)


def multi_head_attention(x, params, num_heads, head_dim):
    """x: (N, in_dim) float32. params: dict of PyTorch-layout weights."""
    N, in_dim = x.shape
    H, D = num_heads, head_dim

    f32 = jnp.float32
    w_in = params["w_in"].astype(f32)                # (S, in_dim)
    b_in = params["b_in"].astype(f32)                # (S,)

    # Fold fc_in into Q/K/V (no nonlinearity in between -> exact):
    #   q = (x @ W_in.T + b_in) @ Wq.T + bq = x @ (Wq @ W_in).T + (Wq @ b_in + bq)
    def fold(w, b):
        return w.astype(f32) @ w_in, w.astype(f32) @ b_in + b.astype(f32)

    aq, cq = fold(params["wq"], params["bq"])
    ak, ck = fold(params["wk"], params["bk"])
    av, cv = fold(params["wv"], params["bv"])

    # Head-major fused QKV weight (H, 3D, in_dim) and bias (H, 1, 3D).
    w_qkv = jnp.concatenate(
        [aq.reshape(H, D, in_dim),
         ak.reshape(H, D, in_dim),
         av.reshape(H, D, in_dim)], axis=1)
    b_qkv = jnp.concatenate(
        [cq.reshape(H, 1, D), ck.reshape(H, 1, D), cv.reshape(H, 1, D)], axis=2)

    # Head-major fc_out weight (H, in_dim, D) and bias (1, in_dim).
    wo = params["wo"].astype(f32).reshape(in_dim, H, D).transpose(1, 0, 2)
    bo = params["bo"].astype(f32).reshape(1, in_dim)

    operands = (x, w_qkv, b_qkv, wo, bo)

    # Single grid point; every operand is handed to the kernel as one full block.
    # ndim is bound eagerly via a default arg (no late-binding closure bug).
    in_specs = [pl.BlockSpec(op.shape, lambda nd=op.ndim: (0,) * nd)
                for op in operands]
    out_spec = pl.BlockSpec((N, in_dim), lambda: (0, 0))

    kernel = functools.partial(_mha_kernel, H, D)

    # TODO(synk): if N / in_dim grow beyond toy size, add a grid over query-row
    # tiles with dimension_semantics=("parallel",) (v7x has 2 TensorCores and
    # only 64 MiB VMEM) and set vmem_limit_bytes explicitly.
    return pl.pallas_call(
        kernel,
        out_shape=jax.ShapeDtypeStruct((N, in_dim), jnp.float32),
        grid=(),
        in_specs=in_specs,
        out_specs=out_spec,
        compiler_params=pltpu.CompilerParams(),
    )(*operands)


def init_params(key, in_dim, num_heads):
    head_dim = max(1, in_dim // num_heads)
    scaled_dim = head_dim * num_heads
    ks = jax.random.split(key, 10)

    def lin(kw, kb, out_f, in_f):
        bound = 1.0 / jnp.sqrt(jnp.asarray(in_f, jnp.float32))
        w = jax.random.uniform(kw, (out_f, in_f), jnp.float32, -bound, bound)
        b = jax.random.uniform(kb, (out_f,), jnp.float32, -bound, bound)
        return w, b

    w_in, b_in = lin(ks[0], ks[1], scaled_dim, in_dim)
    wq, bq = lin(ks[2], ks[3], scaled_dim, scaled_dim)
    wk, bk = lin(ks[4], ks[5], scaled_dim, scaled_dim)
    wv, bv = lin(ks[6], ks[7], scaled_dim, scaled_dim)
    wo, bo = lin(ks[8], ks[9], in_dim, scaled_dim)
    params = dict(w_in=w_in, b_in=b_in, wq=wq, bq=bq, wk=wk, bk=bk,
                  wv=wv, bv=bv, wo=wo, bo=bo)
    return params, num_heads, head_dim


def reference_forward(x, params, num_heads, head_dim):
    """Pure-JAX reference mirroring the PyTorch module."""
    N = x.shape[0]
    h = x @ params["w_in"].T + params["b_in"]
    q = (h @ params["wq"].T + params["bq"]).reshape(N, num_heads, head_dim)
    k = (h @ params["wk"].T + params["bk"]).reshape(N, num_heads, head_dim)
    v = (h @ params["wv"].T + params["bv"]).reshape(N, num_heads, head_dim)
    s = jnp.einsum("nhd,mhd->hnm", q, k) / jnp.sqrt(
        jnp.asarray(head_dim, jnp.float32))
    p = jax.nn.softmax(s, axis=-1)
    out = jnp.einsum("hnm,mhd->nhd", p, v).reshape(N, num_heads * head_dim)
    return out @ params["wo"].T + params["bo"]


if __name__ == "__main__":
    N, in_dim, num_heads = 8, 32, 8

    key = jax.random.PRNGKey(0)
    kp, kx = jax.random.split(key)
    params, num_heads, head_dim = init_params(kp, in_dim, num_heads)
    x = jax.random.normal(kx, (N, in_dim), jnp.float32)

    out = multi_head_attention(x, params, num_heads, head_dim)
    out = jax.block_until_ready(out)

    ref = reference_forward(x, params, num_heads, head_dim)
    assert out.shape == (N, in_dim)
    # fc_in folding + approx reciprocal change rounding slightly -> 2e-3 tol.
    assert jnp.allclose(out, ref, atol=2e-3, rtol=2e-3), "mismatch vs reference"

    print("KERNEL_OK")
</pallas_src>

<mosaic_0001>
module attributes {stable_mosaic.version = 11 : i64} {
  func.func @_mha_kernel(%arg0: memref<8x32xf32, #tpu.memory_space<vmem>>, %arg1: memref<8x12x32xf32, #tpu.memory_space<vmem>>, %arg2: memref<8x1x12xf32, #tpu.memory_space<vmem>>, %arg3: memref<8x32x4xf32, #tpu.memory_space<vmem>>, %arg4: memref<1x32xf32, #tpu.memory_space<vmem>>, %arg5: memref<8x32xf32, #tpu.memory_space<vmem>>) attributes {dimension_semantics = [], scalar_prefetch = 0 : i64, scratch_operands = 0 : i64, tpu.core_type = #tpu.core_type<tc>} {
    %c0 = arith.constant 0 : index
    %c0_0 = arith.constant 0 : index
    %0 = vector.load %arg0[%c0, %c0_0] : memref<8x32xf32, #tpu.memory_space<vmem>>, vector<8x32xf32>
    %1 = vector.shape_cast %0 : vector<8x32xf32> to vector<1x8x32xf32>
    %2 = vector.shape_cast %1 : vector<1x8x32xf32> to vector<1x8x32xf32>
    %3 = vector.broadcast %2 : vector<1x8x32xf32> to vector<8x8x32xf32>
    %c0_1 = arith.constant 0 : index
    %c0_2 = arith.constant 0 : index
    %c0_3 = arith.constant 0 : index
    %4 = vector.load %arg1[%c0_1, %c0_2, %c0_3] : memref<8x12x32xf32, #tpu.memory_space<vmem>>, vector<8x12x32xf32>
    %cst = arith.constant dense<0.000000e+00> : vector<8x8x12xf32>
    %5 = tpu.matmul %3, %4, %cst {dimension_numbers = #tpu.dot_dimension_numbers<[2], [2], [1], [1], [0, 0, 0, 1, 1, 1], [0], [0]>} : vector<8x8x32xf32>, vector<8x12x32xf32>, vector<8x8x12xf32> -> vector<8x8x12xf32>
    %c0_4 = arith.constant 0 : index
    %c0_5 = arith.constant 0 : index
    %c0_6 = arith.constant 0 : index
    %6 = vector.load %arg2[%c0_4, %c0_5, %c0_6] : memref<8x1x12xf32, #tpu.memory_space<vmem>>, vector<8x1x12xf32>
    %7 = vector.broadcast %6 : vector<8x1x12xf32> to vector<8x8x12xf32>
    %8 = arith.addf %5, %7 : vector<8x8x12xf32>
    %9 = vector.extract_strided_slice %8 {offsets = [0, 0, 0], sizes = [8, 8, 4], strides = [1, 1, 1]} : vector<8x8x12xf32> to vector<8x8x4xf32>
    %10 = vector.extract_strided_slice %8 {offsets = [0, 0, 4], sizes = [8, 8, 4], strides = [1, 1, 1]} : vector<8x8x12xf32> to vector<8x8x4xf32>
    %11 = vector.extract_strided_slice %8 {offsets = [0, 0, 8], sizes = [8, 8, 4], strides = [1, 1, 1]} : vector<8x8x12xf32> to vector<8x8x4xf32>
    %cst_7 = arith.constant 4.000000e+00 : f32
    %12 = math.sqrt %cst_7 : f32
    %cst_8 = arith.constant 1.000000e+00 : f32
    %13 = arith.divf %cst_8, %12 : f32
    %cst_9 = arith.constant dense<0.000000e+00> : vector<8x8x8xf32>
    %14 = tpu.matmul %9, %10, %cst_9 {dimension_numbers = #tpu.dot_dimension_numbers<[2], [2], [1], [1], [0, 0, 0, 1, 1, 1], [0], [0]>} : vector<8x8x4xf32>, vector<8x8x4xf32>, vector<8x8x8xf32> -> vector<8x8x8xf32>
    %15 = vector.broadcast %13 : f32 to vector<8x8x8xf32>
    %16 = arith.mulf %14, %15 : vector<8x8x8xf32>
    %cst_10 = arith.constant dense<0xFF800000> : vector<8x8xf32>
    %17 = vector.multi_reduction <maximumf>, %16, %cst_10 [2] : vector<8x8x8xf32> to vector<8x8xf32>
    %18 = vector.shape_cast %17 : vector<8x8xf32> to vector<8x8x1xf32>
    %19 = vector.broadcast %18 : vector<8x8x1xf32> to vector<8x8x8xf32>
    %20 = arith.subf %16, %19 : vector<8x8x8xf32>
    %21 = math.exp %20 : vector<8x8x8xf32>
    %cst_11 = arith.constant dense<0.000000e+00> : vector<8x8xf32>
    %22 = vector.multi_reduction <add>, %21, %cst_11 [2] : vector<8x8x8xf32> to vector<8x8xf32>
    %23 = vector.shape_cast %22 : vector<8x8xf32> to vector<8x8x1xf32>
    %24 = tpu.reciprocal %23 {approx = true} : vector<8x8x1xf32> -> vector<8x8x1xf32>
    %25 = vector.broadcast %24 : vector<8x8x1xf32> to vector<8x8x8xf32>
    %26 = arith.mulf %21, %25 : vector<8x8x8xf32>
    %cst_12 = arith.constant dense<0.000000e+00> : vector<8x8x4xf32>
    %27 = tpu.matmul %26, %11, %cst_12 {dimension_numbers = #tpu.dot_dimension_numbers<[2], [1], [1], [2], [0, 0, 0, 1, 1, 2], [0], [0]>} : vector<8x8x8xf32>, vector<8x8x4xf32>, vector<8x8x4xf32> -> vector<8x8x4xf32>
    %c0_13 = arith.constant 0 : index
    %c0_14 = arith.constant 0 : index
    %c0_15 = arith.constant 0 : index
    %28 = vector.load %arg3[%c0_13, %c0_14, %c0_15] : memref<8x32x4xf32, #tpu.memory_space<vmem>>, vector<8x32x4xf32>
    %cst_16 = arith.constant dense<0.000000e+00> : vector<8x8x32xf32>
    %29 = tpu.matmul %27, %28, %cst_16 {dimension_numbers = #tpu.dot_dimension_numbers<[2], [2], [1], [1], [0, 0, 0, 1, 1, 1], [0], [0]>} : vector<8x8x4xf32>, vector<8x32x4xf32>, vector<8x8x32xf32> -> vector<8x8x32xf32>
    %cst_17 = arith.constant dense<0.000000e+00> : vector<8x32xf32>
    %30 = vector.multi_reduction <add>, %29, %cst_17 [0] : vector<8x8x32xf32> to vector<8x32xf32>
    %c0_18 = arith.constant 0 : index
    %c0_19 = arith.constant 0 : index
    %31 = vector.load %arg4[%c0_18, %c0_19] : memref<1x32xf32, #tpu.memory_space<vmem>>, vector<1x32xf32>
    %32 = vector.broadcast %31 : vector<1x32xf32> to vector<8x32xf32>
    %33 = arith.addf %30, %32 : vector<8x32xf32>
    %c0_20 = arith.constant 0 : index
    %c0_21 = arith.constant 0 : index
    %34 = vector.load %arg5[%c0_20, %c0_21] : memref<8x32xf32, #tpu.memory_space<vmem>>, vector<8x32xf32>
    tpu.vector_store %arg5[%c0_20, %c0_21], %33 {strides = array<i32>} : memref<8x32xf32, #tpu.memory_space<vmem>>, vector<8x32xf32>,
    return
  }
}

</mosaic_0001>

<bundles_post_ra>
// kernel: tpu_custom_call.1
= control target key start
LH: loop header
LB: loop body
LE: loop exit
PB: predicated region body
PF: predicated region fallthrough
CT: control target
= control target key end

     0   :  { %vm94_vm0 = vcmask 261120   ;;  %v3353_v3 = vmov 0.0|0.0   ;;  %vm3354_vm2 = vmmov 0   ;;  %v3355_v8 = vmov 0.0   ;;  %s3875_s0 = inlined_call_operand.vmem [shape: f32[8,32], index: 0, kind: input, shape index: {}]   ;;  %s3876_s1 = inlined_call_operand.vmem [shape: f32[8,12,32], index: 1, kind: input, shape index: {}]   ;;  %s3877_s2 = inlined_call_operand.vmem [shape: f32[8,1,12], index: 2, kind: input, shape index: {}]   ;;  %s3878_s3 = inlined_call_operand.vmem [shape: f32[8,32,4], index: 3, kind: input, shape index: {}]   ;;  %s3879_s4 = inlined_call_operand.vmem [shape: f32[1,32], index: 4, kind: input, shape index: {}]   ;;  %s3880_s5 = inlined_call_operand.hbm [shape: f32[8,32], index: 5, kind: output, shape index: {}]  }
   0x1   :  { %v22_v0 = vld [vmem:[%s3876_s1] sm:$0xff]  ;;  %v23_v1 = vld [vmem:[%s3876_s1 + $0x8] sm:$0xf]  ;;  %v24_v2 = vld [vmem:[%s3876_s1 + $0x10] sm:$0xff]  ;;  %3195 = vmatprep.subr.bf16.mxu0 %v3353_v3  ;;  %3199 = vmatprep.subr.bf16.mxu1 %v3353_v3 }
   0x2   :  { %v3196_v4 = vpack.c.bf16 %v23_v1, %v22_v0  ;;  %vm3402_vm1 = vmpackc.low %vm94_vm0, %vm94_vm0  ;;  %v25_v6 = vld [vmem:[%s3876_s1 + $0x18] sm:$0xf]  ;;  %2975 = vmatprep.mubr.msk.f32.mxu0 %vm3354_vm2, %v3355_v8  ;;  %2982 = vmatprep.mubr.msk.f32.mxu1 %vm3354_vm2, %v3355_v8  ;;  %v26_v9 = vld [vmem:[%s3876_s1 + $0x20] sm:$0xff] }
   0x3   :  { %v3200_v7 = vpack.c.bf16 %v25_v6, %v24_v2  ;;  %v27_v10 = vld [vmem:[%s3876_s1 + $0x28] sm:$0xf]  ;;  %v28_v11 = vld [vmem:[%s3876_s1 + $0x30] sm:$0xff]  ;;  %v29_v12 = vld [vmem:[%s3876_s1 + $0x38] sm:$0xf] }
   0x4   :  { %3198 = vmatpush3.bf16.xpose.msk.msra.mxu0 %vm3402_vm1, %v3196_v4 }
   0x5   :  { %3202 = vmatpush3.bf16.xpose.msk.msra.mxu1 %vm3402_vm1, %v3200_v7  ;;  %3203 = vmatprep.subr.bf16.mxu0 %v3353_v3 }
   0x6   :  { %3207 = vmatprep.subr.bf16.mxu1 %v3353_v3 }
   0x7   :  { %10 = vsyncpa [#allocation3], 0  ;;  %v21_v13 = vld [vmem:[%s3875_s0] sm:$0xff]  ;;  %v3204_v14 = vpack.c.bf16 %v27_v10, %v26_v9  ;;  %v3208_v15 = vpack.c.bf16 %v29_v12, %v28_v11  ;;  %v31_v17 = vld [vmem:[%s3876_s1 + $0x48] sm:$0xf]  ;;  %s3356_s29 = smov 124  }
   0x8   :  { %v30_v16 = vld [vmem:[%s3876_s1 + $0x40] sm:$0xff]  ;;  %v32_v18 = vld [vmem:[%s3876_s1 + $0x50] sm:$0xff]  ;;  %v33_v19 = vld [vmem:[%s3876_s1 + $0x58] sm:$0xf]  ;;  %s3357_s16 = smov 120   ;;  %vm709_vm3 = vcmask 31744  }
   0x9   :  { %v3212_v20 = vpack.c.bf16 %v31_v17, %v30_v16  ;;  %v3216_v21 = vpack.c.bf16 %v33_v19, %v32_v18  ;;  %v34_v22 = vld [vmem:[%s3876_s1 + $0x60] sm:$0xff]  ;;  %v35_v23 = vld [vmem:[%s3876_s1 + $0x68] sm:$0xf]  ;;  %v36_v24 = vld [vmem:[%s3876_s1 + $0x70] sm:$0xff]  ;;  %vm1331_vm4 = vcmask 64512   ;;  %s3358_s25 = smov [#allocation2]  }
   0xa   :  { %v37_v25 = vld [vmem:[%s3876_s1 + $0x78] sm:$0xf]  ;;  %v3220_v26 = vpack.c.bf16 %v35_v23, %v34_v22  ;;  %v2778_v28 = vld [vmem:[%s3877_s2] ss:$0 sm:$0xff]  ;;  %v2779_v30 = vld [vmem:[%s3877_s2 + $0x1] ss:$0 sm:$0xff] }
   0xb   :  { %2976 = vmatmul.mubr.msk.f32.vlgmr.msra.gmra.mrb[0].mxu0 %vm94_vm0, %v21_v13  ;;  %v3224_v27 = vpack.c.bf16 %v37_v25, %v36_v24  ;;  %v2780_v36 = vld [vmem:[%s3877_s2 + $0x2] ss:$0 sm:$0xff]  ;;  %v2781_v38 = vld [vmem:[%s3877_s2 + $0x3] ss:$0 sm:$0xff]  ;;  %v2782_v44 = vld [vmem:[%s3877_s2 + $0x4] ss:$0 sm:$0xff] }
   0xc   :  { %2983 = vmatmul.mubr.msk.f32.vlgmr.msra.gmra.mrb[0].mxu1 %vm94_vm0, %v21_v13  ;;  %3206 = vmatpush3.bf16.xpose.msk.msra.mxu0 %vm3402_vm1, %v3204_v14  ;;  %v2783_v45 = vld [vmem:[%s3877_s2 + $0x5] ss:$0 sm:$0xff]  ;;  %v2784_v52 = vld [vmem:[%s3877_s2 + $0x6] ss:$0 sm:$0xff]  ;;  %v2785_v53 = vld [vmem:[%s3877_s2 + $0x7] ss:$0 sm:$0xff] }
   0xd   :  { %3210 = vmatpush3.bf16.xpose.msk.msra.mxu1 %vm3402_vm1, %v3208_v15  ;;  %2989 = vmatprep.mubr.msk.f32.mxu0 %vm3354_vm2, %v3355_v8  ;;  %vm3682_vm5 = vmpackc.low %vm709_vm3, %vm709_vm3  ;;  %s2770_s1 = sshll.u32 %s3358_s25, 4  ;;  %s2771_s1 = int_to_ptr.vmem [resolvable:$true] %s2770_s1 }
   0xe   :  { %2996 = vmatprep.mubr.msk.f32.mxu1 %vm3354_vm2, %v3355_v8  ;;  %3211 = vmatprep.subr.bf16.mxu0 %v3353_v3  ;;  %s3329_s26 = scalar_lea.vmem %s2771_s1, 128  ;;  %p3334_p1 = scmp.lt.s32.totalorder %s2771_s1, %s2771_s1 }
   0xf   :  { %3215 = vmatprep.subr.bf16.mxu1 %v3353_v3  ;;  %p3330_p0 = scmp.ne.s32.totalorder %s2771_s1, %s3329_s26  ;;  %p3335_p2 = scmp.lt.s32.totalorder %s3329_s26, %s3329_s26 }
  0x11   :  { %p3336_p3 = por %p3335_p2, %p3334_p1 }
  0x13   :  { %2990 = vmatmul.mubr.msk.f32.vlgmr.msra.gmra.mrb[2].mxu0 %vm94_vm0, %v21_v13  ;;  %p3337_p4 = pnand %p3336_p3, %p3330_p0 }
  0x14   :  { %2997 = vmatmul.mubr.msk.f32.vlgmr.msra.gmra.mrb[2].mxu1 %vm94_vm0, %v21_v13  ;;  %3214 = vmatpush3.bf16.xpose.msk.msra.mxu0 %vm3402_vm1, %v3212_v20 }
  0x15   :  { %3218 = vmatpush3.bf16.xpose.msk.msra.mxu1 %vm3402_vm1, %v3216_v21  ;;  %3003 = vmatprep.mubr.msk.f32.mxu0 %vm3354_vm2, %v3355_v8 }
  0x16   :  { %3010 = vmatprep.mubr.msk.f32.mxu1 %vm3354_vm2, %v3355_v8  ;;  %3219 = vmatprep.subr.bf16.mxu0 %v3353_v3 }
  0x17   :  { %3223 = vmatprep.subr.bf16.mxu1 %v3353_v3 }
  0x1b   :  { %3004 = vmatmul.mubr.msk.f32.vlgmr.msra.gmra.mrb[4].mxu0 %vm94_vm0, %v21_v13 }
  0x1c   :  { %3011 = vmatmul.mubr.msk.f32.vlgmr.msra.gmra.mrb[4].mxu1 %vm94_vm0, %v21_v13  ;;  %3222 = vmatpush3.bf16.xpose.msk.msra.mxu0 %vm3402_vm1, %v3220_v26 }
  0x1d   :  { %3226 = vmatpush3.bf16.xpose.msk.msra.mxu1 %vm3402_vm1, %v3224_v27  ;;  %3017 = vmatprep.mubr.msk.f32.mxu0 %vm3354_vm2, %v3355_v8 }
  0x1e   :  { %3024 = vmatprep.mubr.msk.f32.mxu1 %vm3354_vm2, %v3355_v8  ;;  %3027 = vmatprep.subr.mxu0 %v3355_v8 }
  0x1f   :  { %3032 = vmatprep.subr.mxu1 %v3355_v8 }
  0x23   :  { %3018 = vmatmul.mubr.msk.f32.vlgmr.msra.gmra.mrb[6].mxu0 %vm94_vm0, %v21_v13 }
  0x24   :  { %3025 = vmatmul.mubr.msk.f32.vlgmr.msra.gmra.mrb[6].mxu1 %vm94_vm0, %v21_v13  ;;  %3029 = vmatprep.mubr.msk.f32.mxu0 %vm3354_vm2, %v3355_v8 }
  0x25   :  { %3034 = vmatprep.mubr.msk.f32.mxu1 %vm3354_vm2, %v3355_v8 }
  0xde   :  { %v170_v29 = vpop.f32.mrb[0].mxu0 }
  0xdf   :  { %v171_v31 = vadd.f32 %v2778_v28, %v170_v29  ;;  %v2977_v32 = vpop.f32.mrb[1].mxu0  ;;  %v246_v33 = vpop.f32.mrb[0].mxu1 }
  0xe0   :  { %v2984_v34 = vpop.f32.mrb[1].mxu1  ;;  %v3507_v35 = vadd.f32 %v2779_v30, %v246_v33 }
  0xe1   :  { %707 = vrot.lane.b32.xlu0 %v171_v31, %s3356_s29 }
  0xe5   :  { %785 = vrot.lane.b32.xlu0 %v3507_v35, %s3356_s29 }
  0xe6   :  { %v322_v37 = vpop.f32.mrb[2].mxu0 }
  0xe7   :  { %v3517_v39 = vadd.f32 %v2780_v36, %v322_v37  ;;  %v2991_v40 = vpop.f32.mrb[3].mxu0  ;;  %v398_v41 = vpop.f32.mrb[2].mxu1 }
  0xe8   :  { %v2998_v42 = vpop.f32.mrb[3].mxu1  ;;  %v3519_v43 = vadd.f32 %v2781_v38, %v398_v41 }
  0xe9   :  { %862 = vrot.lane.b32.xlu1 %v3517_v39, %s3356_s29 }
  0xed   :  { %939 = vrot.lane.b32.xlu1 %v3519_v43, %s3356_s29 }
  0xee   :  { %v474_v46 = vpop.f32.mrb[4].mxu0 }
  0xef   :  { %v3531_v47 = vadd.f32 %v2782_v44, %v474_v46  ;;  %v550_v48 = vpop.f32.mrb[4].mxu1  ;;  %v3005_v49 = vpop.f32.mrb[5].mxu0 }
  0xf0   :  { %v3533_v50 = vadd.f32 %v2783_v45, %v550_v48  ;;  %v3012_v51 = vpop.f32.mrb[5].mxu1 }
  0xf1   :  { %1016 = vrot.lane.b32.xlu0 %v3531_v47, %s3356_s29 }
  0xf2   :  { %1093 = vrot.lane.b32.xlu1 %v3533_v50, %s3356_s29 }
  0xf6   :  { %v626_v54 = vpop.f32.mrb[6].mxu0 }
  0xf7   :  { %v3545_v55 = vadd.f32 %v2784_v52, %v626_v54  ;;  %v702_v56 = vpop.f32.mrb[6].mxu1  ;;  %v3019_v57 = vpop.f32.mrb[7].mxu0 }
  0xf8   :  { %v3547_v58 = vadd.f32 %v2785_v53, %v702_v56  ;;  %v3026_v59 = vpop.f32.mrb[7].mxu1 }
  0xf9   :  { %1170 = vrot.lane.b32.xlu0 %v3545_v55, %s3356_s29 }
  0xfa   :  { %1247 = vrot.lane.b32.xlu1 %v3547_v58, %s3356_s29 }
  0xfe   :  { %1420 = vrot.lane.b32.xlu1 %v171_v31, %s3357_s16 }
 0x153   :  { %v708_v60 = vpop.permute.xlu0 %707 }
 0x154   :  { %3028 = vmatpush3.xpose.msk.msra.mxu0 %vm709_vm3, %v708_v60 }
 0x155   :  { %3037 = vmatprep.subr.mxu0 %v3355_v8 }
 0x157   :  { %3030 = vmatmul.mubr.msk.f32.vlgmr.msra.gmra.mrb[8].mxu0 %vm709_vm3, %v171_v31  ;;  %v786_v61 = vpop.permute.xlu0 %785 }
 0x158   :  { %3033 = vmatpush3.xpose.msk.msra.mxu1 %vm709_vm3, %v786_v61  ;;  %3039 = vmatprep.mubr.msk.f32.mxu0 %vm3354_vm2, %v3355_v8 }
 0x159   :  { %3042 = vmatprep.subr.mxu1 %v3355_v8 }
 0x15b   :  { %3035 = vmatmul.mubr.msk.f32.vlgmr.msra.gmra.mrb[8].mxu1 %vm709_vm3, %v3507_v35  ;;  %v863_v62 = vpop.permute.xlu1 %862 }
 0x15c   :  { %3038 = vmatpush3.xpose.msk.msra.mxu0 %vm709_vm3, %v863_v62  ;;  %3044 = vmatprep.mubr.msk.f32.mxu1 %vm3354_vm2, %v3355_v8 }
 0x15d   :  { %3047 = vmatprep.subr.mxu0 %v3355_v8 }
 0x15f   :  { %3040 = vmatmul.mubr.msk.f32.vlgmr.msra.gmra.mrb[10].mxu0 %vm709_vm3, %v3517_v39  ;;  %v940_v63 = vpop.permute.xlu1 %939 }
 0x160   :  { %3043 = vmatpush3.xpose.msk.msra.mxu1 %vm709_vm3, %v940_v63  ;;  %3049 = vmatprep.mubr.msk.f32.mxu0 %vm3354_vm2, %v3355_v8 }
 0x161   :  { %3052 = vmatprep.subr.mxu1 %v3355_v8 }
 0x163   :  { %3045 = vmatmul.mubr.msk.f32.vlgmr.msra.gmra.mrb[10].mxu1 %vm709_vm3, %v3519_v43  ;;  %v1017_v0 = vpop.permute.xlu0 %1016 }
 0x164   :  { %v1094_v1 = vpop.permute.xlu1 %1093  ;;  %3048 = vmatpush3.xpose.msk.msra.mxu0 %vm709_vm3, %v1017_v0  ;;  %3054 = vmatprep.mubr.msk.f32.mxu1 %vm3354_vm2, %v3355_v8 }
 0x165   :  { %3053 = vmatpush3.xpose.msk.msra.mxu1 %vm709_vm3, %v1094_v1  ;;  %3057 = vmatprep.subr.mxu0 %v3355_v8 }
 0x166   :  { %3062 = vmatprep.subr.mxu1 %v3355_v8 }
 0x167   :  { %3050 = vmatmul.mubr.msk.f32.vlgmr.msra.gmra.mrb[12].mxu0 %vm709_vm3, %v3531_v47 }
 0x168   :  { %3055 = vmatmul.mubr.msk.f32.vlgmr.msra.gmra.mrb[12].mxu1 %vm709_vm3, %v3533_v50  ;;  %3059 = vmatprep.mubr.msk.f32.mxu0 %vm3354_vm2, %v3355_v8 }
 0x169   :  { %3064 = vmatprep.mubr.msk.f32.mxu1 %vm3354_vm2, %v3355_v8 }
 0x16b   :  { %v1171_v2 = vpop.permute.xlu0 %1170 }
 0x16c   :  { %v1248_v4 = vpop.permute.xlu1 %1247  ;;  %3058 = vmatpush3.xpose.msk.msra.mxu0 %vm709_vm3, %v1171_v2 }
 0x16d   :  { %3063 = vmatpush3.xpose.msk.msra.mxu1 %vm709_vm3, %v1248_v4  ;;  %3067 = vmatprep.subr.mxu0 %v3355_v8 }
 0x16e   :  { %3072 = vmatprep.subr.mxu1 %v3355_v8 }
 0x16f   :  { %3060 = vmatmul.mubr.msk.f32.vlgmr.msra.gmra.mrb[14].mxu0 %vm709_vm3, %v3545_v55 }
 0x170   :  { %3065 = vmatmul.mubr.msk.f32.vlgmr.msra.gmra.mrb[14].mxu1 %vm709_vm3, %v3547_v58  ;;  %v1421_v5 = vpop.permute.xlu1 %1420  ;;  %3069 = vmatprep.mubr.msk.f32.mxu0 %vm3354_vm2, %v3355_v8 }
 0x171   :  { %3068 = vmatpush3.msra.mxu0 %v1421_v5  ;;  %3074 = vmatprep.mubr.msk.f32.mxu1 %vm3354_vm2, %v3355_v8 }
 0x172   :  { %3077 = vmatprep.subr.mxu0 %v3355_v8 }
 0x22a   :  { %v780_v6 = vpop.f32.mrb[8].mxu0 }
 0x22b   :  { %v1323_v7 = vmul.f32 0.5, %v780_v6  ;;  %v3031_v9 = vpop.f32.mrb[9].mxu0 }
 0x22d   :  { %v1332_v10 = vsel %vm1331_vm4, %v1323_v7, -inf }
 0x22e   :  { %v857_v11 = vpop.f32.mrb[8].mxu1  ;;  %1333 = vmax.xlane.f32.xlu0 %v1332_v10 }
 0x22f   :  { %v1324_v12 = vmul.f32 0.5, %v857_v11  ;;  %v3036_v13 = vpop.f32.mrb[9].mxu1 }
 0x231   :  { %v1335_v14 = vsel %vm1331_vm4, %v1324_v12, -inf }
 0x232   :  { %1336 = vmax.xlane.f32.xlu1 %v1335_v14  ;;  %v934_v15 = vpop.f32.mrb[10].mxu0 }
 0x233   :  { %v1325_v16 = vmul.f32 0.5, %v934_v15  ;;  %v3041_v17 = vpop.f32.mrb[11].mxu0 }
 0x235   :  { %v1338_v18 = vsel %vm1331_vm4, %v1325_v16, -inf }
 0x236   :  { %v1011_v19 = vpop.f32.mrb[10].mxu1  ;;  %1339 = vmax.xlane.f32.xlu0 %v1338_v18 }
 0x237   :  { %v1326_v20 = vmul.f32 0.5, %v1011_v19  ;;  %v3046_v21 = vpop.f32.mrb[11].mxu1 }
 0x239   :  { %v1341_v22 = vsel %vm1331_vm4, %v1326_v20, -inf }
 0x23a   :  { %1342 = vmax.xlane.f32.xlu0 %v1341_v22  ;;  %v1088_v23 = vpop.f32.mrb[12].mxu0 }
 0x23b   :  { %v1165_v24 = vpop.f32.mrb[12].mxu1  ;;  %v1327_v25 = vmul.f32 0.5, %v1088_v23  ;;  %v3051_v26 = vpop.f32.mrb[13].mxu0 }
 0x23c   :  { %v1328_v27 = vmul.f32 0.5, %v1165_v24  ;;  %v3056_v28 = vpop.f32.mrb[13].mxu1 }
 0x23d   :  { %v1344_v29 = vsel %vm1331_vm4, %v1327_v25, -inf }
 0x23e   :  { %v1347_v30 = vsel %vm1331_vm4, %v1328_v27, -inf  ;;  %1345 = vmax.xlane.f32.xlu1 %v1344_v29 }
 0x23f   :  { %1348 = vmax.xlane.f32.xlu0 %v1347_v30 }
 0x242   :  { %v1242_v31 = vpop.f32.mrb[14].mxu0 }
 0x243   :  { %v1329_v32 = vmul.f32 0.5, %v1242_v31  ;;  %v1319_v33 = vpop.f32.mrb[14].mxu1  ;;  %v3061_v34 = vpop.f32.mrb[15].mxu0 }
 0x244   :  { %v1330_v36 = vmul.f32 0.5, %v1319_v33  ;;  %v3066_v37 = vpop.f32.mrb[15].mxu1 }
 0x245   :  { %v1350_v38 = vsel %vm1331_vm4, %v1329_v32, -inf }
 0x246   :  { %v1353_v40 = vsel %vm1331_vm4, %v1330_v36, -inf  ;;  %1351 = vmax.xlane.f32.xlu1 %v1350_v38 }
 0x247   :  { %1354 = vmax.xlane.f32.xlu0 %v1353_v40 }
 0x257   :  { %1572 = vrot.lane.b32.xlu1 %v3517_v39, %s3357_s16 }
 0x25d   :  { %1496 = vrot.lane.b32.xlu0 %v3507_v35, %s3357_s16 }
 0x2bb   :  { %v1334_v41 = vpop.xlane.xlu0 %1333 }
 0x2bc   :  { %v1356_v42 = vsub.f32 %v1323_v7, %v1334_v41 }
 0x2be   :  { %v1364_v44 = vmul.f32 1.442695, %v1356_v42 }
 0x2bf   :  { %v1337_v45 = vpop.xlane.xlu1 %1336 }
 0x2c0   :  { %3297 = vpow2.f32 %v1364_v44  ;;  %v1357_v46 = vsub.f32 %v1324_v12, %v1337_v45  ;;  %v2028_v45 = vld [vmem:[%s3878_s3] sm:$0xff] }
 0x2c2   :  { %v1366_v48 = vmul.f32 1.442695, %v1357_v46  ;;  %v2029_v46 = vld [vmem:[%s3878_s3 + $0x8] sm:$0xff] }
 0x2c3   :  { %v1340_v49 = vpop.xlane.xlu0 %1339 }
 0x2c4   :  { %3299 = vpow2.f32 %v1366_v48  ;;  %v1358_v51 = vsub.f32 %v1325_v16, %v1340_v49 }
 0x2c6   :  { %v1368_v52 = vmul.f32 1.442695, %v1358_v51 }
 0x2c7   :  { %v1343_v53 = vpop.xlane.xlu0 %1342 }
 0x2c8   :  { %3301 = vpow2.f32 %v1368_v52  ;;  %v1359_v54 = vsub.f32 %v1326_v20, %v1343_v53  ;;  %v3228_v53 = vpack.c.bf16 %v2029_v46, %v2028_v45 }
 0x2ca   :  { %v3298_v56 = vpop.eup %3297  ;;  %v1370_v57 = vmul.f32 1.442695, %v1359_v54 }
 0x2cb   :  { %v1380_v39 = vsel %vm1331_vm4, %v3298_v56, 0.0  ;;  %v1346_v4 = vpop.xlane.xlu1 %1345 }
 0x2cc   :  { %3303 = vpow2.f32 %v1370_v57  ;;  %1381 = vadd.xlane.f32.xlu1 %v1380_v39  ;;  %v1349_v60 = vpop.xlane.xlu0 %1348  ;;  %v1360_v5 = vsub.f32 %v1327_v25, %v1346_v4  ;;  %v2032_v57 = vld [vmem:[%s3878_s3 + $0x20] sm:$0xff]  ;;  %v2033_v39 = vld [vmem:[%s3878_s3 + $0x28] sm:$0xff] }
 0x2cd   :  { %v1361_v7 = vsub.f32 %v1328_v27, %v1349_v60  ;;  %v2030_v60 = vld [vmem:[%s3878_s3 + $0x10] sm:$0xff]  ;;  %v2037_v4 = vld [vmem:[%s3878_s3 + $0x48] sm:$0xff] }
 0x2ce   :  { %v3300_v35 = vpop.eup %3299  ;;  %v1372_v9 = vmul.f32 1.442695, %v1360_v5 }
 0x2cf   :  { %v1383_v59 = vsel %vm1331_vm4, %v3300_v35, 0.0  ;;  %v1374_v11 = vmul.f32 1.442695, %v1361_v7  ;;  %v2041_v7 = vld [vmem:[%s3878_s3 + $0x68] sm:$0xff] }
 0x2d0   :  { %1384 = vadd.xlane.f32.xlu0 %v1383_v59  ;;  %3305 = vpow2.f32 %v1372_v9  ;;  %v3236_v59 = vpack.c.bf16 %v2033_v39, %v2032_v57 }
 0x2d1   :  { %3307 = vpow2.f32 %v1374_v11 }
 0x2d2   :  { %v3616_v61 = vpop.eup %3301 }
 0x2d3   :  { %v1386_v62 = vsel %vm1331_vm4, %v3616_v61, 0.0  ;;  %v1352_v6 = vpop.xlane.xlu1 %1351 }
 0x2d4   :  { %v1355_v63 = vpop.xlane.xlu0 %1354  ;;  %1387 = vadd.xlane.f32.xlu1 %v1386_v62  ;;  %v1362_v10 = vsub.f32 %v1329_v32, %v1352_v6  ;;  %v2040_v6 = vld [vmem:[%s3878_s3 + $0x60] sm:$0xff] }
 0x2d5   :  { %v1363_v12 = vsub.f32 %v1330_v36, %v1355_v63  ;;  %v2034_v63 = vld [vmem:[%s3878_s3 + $0x30] sm:$0xff]  ;;  %v3252_v11 = vpack.c.bf16 %v2041_v7, %v2040_v6 }
 0x2d6   :  { %v3620_v0 = vpop.eup %3303  ;;  %v1376_v13 = vmul.f32 1.442695, %v1362_v10 }
 0x2d7   :  { %v1389_v1 = vsel %vm1331_vm4, %v3620_v0, 0.0  ;;  %v1378_v14 = vmul.f32 1.442695, %v1363_v12  ;;  %v1573_v21 = vpop.permute.xlu1 %1572  ;;  %v2038_v12 = vld [vmem:[%s3878_s3 + $0x50] sm:$0xff] }
 0x2d8   :  { %v1497_v2 = vpop.permute.xlu0 %1496  ;;  %1390 = vadd.xlane.f32.xlu0 %v1389_v1  ;;  %3309 = vpow2.f32 %v1376_v13  ;;  %v2039_v13 = vld [vmem:[%s3878_s3 + $0x58] sm:$0xff] }
 0x2d9   :  { %3073 = vmatpush3.msra.mxu1 %v1497_v2  ;;  %3311 = vpow2.f32 %v1378_v14  ;;  %v2036_v2 = vld [vmem:[%s3878_s3 + $0x40] sm:$0xff] }
 0x2da   :  { %3082 = vmatprep.subr.mxu1 %v3355_v8  ;;  %v3306_v15 = vpop.eup %3305  ;;  %v3244_v5 = vpack.c.bf16 %v2037_v4, %v2036_v2 }
 0x2db   :  { %v3629_v16 = vpop.eup %3307 }
 0x2dc   :  { %v1395_v17 = vsel %vm1331_vm4, %v3629_v16, 0.0 }
 0x2e5   :  { %1724 = vrot.lane.b32.xlu1 %v3531_v47, %s3357_s16  ;;  %v1392_v47 = vsel %vm1331_vm4, %v3306_v15, 0.0 }
 0x2ee   :  { %1648 = vrot.lane.b32.xlu0 %v3519_v43, %s3357_s16  ;;  %v3632_v43 = vpop.eup %3309 }
 0x2ef   :  { %v1398_v18 = vsel %vm1331_vm4, %v3632_v43, 0.0  ;;  %v3638_v19 = vpop.eup %3311 }
 0x2f0   :  { %v1401_v20 = vsel %vm1331_vm4, %v3638_v19, 0.0 }
 0x309   :  { %1393 = vadd.xlane.f32.xlu1 %v1392_v47  ;;  %v2042_v47 = vld [vmem:[%s3878_s3 + $0x70] sm:$0xff] }
 0x30d   :  { %1396 = vadd.xlane.f32.xlu0 %v1395_v17  ;;  %1399 = vadd.xlane.f32.xlu1 %v1398_v18 }
 0x311   :  { %1402 = vadd.xlane.f32.xlu0 %v1401_v20  ;;  %v2044_v20 = vld [vmem:[%s3878_s3 + $0x80] sm:$0xff] }
 0x31e   :  { %1876 = vrot.lane.b32.xlu1 %v3545_v55, %s3357_s16 }
 0x322   :  { %1952 = vrot.lane.b32.xlu1 %v3547_v58, %s3357_s16 }
 0x327   :  { %1800 = vrot.lane.b32.xlu0 %v3533_v50, %s3357_s16 }
 0x359   :  { %v1382_v22 = vpop.xlane.xlu1 %1381 }
 0x35a   :  { %3313 = vrcp.f32 %v1382_v22 }
 0x35d   :  { %v1385_v23 = vpop.xlane.xlu0 %1384 }
 0x35e   :  { %3315 = vrcp.f32 %v1385_v23 }
 0x361   :  { %v1388_v24 = vpop.xlane.xlu1 %1387 }
 0x362   :  { %3317 = vrcp.f32 %v1388_v24 }
 0x364   :  { %v3314_v25 = vpop.eup %3313 }
 0x365   :  { %v1412_v26 = vmul.f32 %v3314_v25, %v3298_v56  ;;  %v1391_v27 = vpop.xlane.xlu0 %1390  ;;  %v1725_v30 = vpop.permute.xlu1 %1724  ;;  %v2048_v25 = vld [vmem:[%s3878_s3 + $0xa0] sm:$0xff] }
 0x366   :  { %3319 = vrcp.f32 %v1391_v27 }
 0x367   :  { %3070 = vmatmul.mubr.msk.f32.vlgmr.msra.gmra.mrb[16].mxu0 %vm1331_vm4, %v1412_v26  ;;  %v2049_v26 = vld [vmem:[%s3878_s3 + $0xa8] sm:$0xff] }
 0x368   :  { %v3316_v55 = vpop.eup %3315  ;;  %3078 = vmatpush3.msra.mxu0 %v1573_v21  ;;  %3079 = vmatprep.mubr.msk.f32.mxu0 %vm3354_vm2, %v3355_v8  ;;  %v2045_v21 = vld [vmem:[%s3878_s3 + $0x88] sm:$0xff]  ;;  %v3268_v27 = vpack.c.bf16 %v2049_v26, %v2048_v25 }
 0x369   :  { %v1413_v58 = vmul.f32 %v3316_v55, %v3300_v35  ;;  %v1649_v50 = vpop.permute.xlu0 %1648  ;;  %3087 = vmatprep.subr.mxu0 %v3355_v8  ;;  %v3260_v24 = vpack.c.bf16 %v2045_v21, %v2044_v20  ;;  %v2046_v55 = vld [vmem:[%s3878_s3 + $0x90] sm:$0xff] }
 0x36b   :  { %3075 = vmatmul.mubr.msk.f32.vlgmr.msra.gmra.mrb[16].mxu1 %vm1331_vm4, %v1413_v58  ;;  %v2047_v58 = vld [vmem:[%s3878_s3 + $0x98] sm:$0xff] }
 0x36c   :  { %v3318_v28 = vpop.eup %3317  ;;  %3083 = vmatpush3.msra.mxu1 %v1649_v50  ;;  %3084 = vmatprep.mubr.msk.f32.mxu1 %vm3354_vm2, %v3355_v8  ;;  %v3264_v50 = vpack.c.bf16 %v2047_v58, %v2046_v55 }
 0x36d   :  { %v1414_v29 = vmul.f32 %v3318_v28, %v3616_v61  ;;  %3092 = vmatprep.subr.mxu1 %v3355_v8  ;;  %v2031_v61 = vld [vmem:[%s3878_s3 + $0x18] sm:$0xff]  ;;  %v2050_v28 = vld [vmem:[%s3878_s3 + $0xb0] sm:$0xff] }
 0x36e   :  { %v3232_v62 = vpack.c.bf16 %v2031_v61, %v2030_v60 }
 0x36f   :  { %3080 = vmatmul.mubr.msk.f32.vlgmr.msra.gmra.mrb[18].mxu0 %vm1331_vm4, %v1414_v29  ;;  %v2051_v29 = vld [vmem:[%s3878_s3 + $0xb8] sm:$0xff] }
 0x370   :  { %v3320_v31 = vpop.eup %3319  ;;  %3088 = vmatpush3.msra.mxu0 %v1725_v30  ;;  %3089 = vmatprep.mubr.msk.f32.mxu0 %vm3354_vm2, %v3355_v8  ;;  %v3272_v30 = vpack.c.bf16 %v2051_v29, %v2050_v28 }
 0x371   :  { %v1415_v32 = vmul.f32 %v3320_v31, %v3620_v0  ;;  %3097 = vmatprep.subr.mxu0 %v3355_v8  ;;  %v2035_v0 = vld [vmem:[%s3878_s3 + $0x38] sm:$0xff]  ;;  %v2052_v31 = vld [vmem:[%s3878_s3 + $0xc0] sm:$0xff] }
 0x372   :  { %v3240_v1 = vpack.c.bf16 %v2035_v0, %v2034_v63 }
 0x373   :  { %3085 = vmatmul.mubr.msk.f32.vlgmr.msra.gmra.mrb[18].mxu1 %vm1331_vm4, %v1415_v32  ;;  %v2053_v32 = vld [vmem:[%s3878_s3 + $0xc8] sm:$0xff] }
 0x374   :  { %3094 = vmatprep.mubr.msk.f32.mxu1 %vm3354_vm2, %v3355_v8 }
 0x396   :  { %v1394_v33 = vpop.xlane.xlu1 %1393 }
 0x397   :  { %3321 = vrcp.f32 %v1394_v33  ;;  %v3276_v33 = vpack.c.bf16 %v2053_v32, %v2052_v31 }
 0x39a   :  { %v1397_v34 = vpop.xlane.xlu0 %1396  ;;  %v1400_v36 = vpop.xlane.xlu1 %1399 }
 0x39b   :  { %3323 = vrcp.f32 %v1397_v34  ;;  %v2056_v34 = vld [vmem:[%s3878_s3 + $0xe0] sm:$0xff] }
 0x39c   :  { %3325 = vrcp.f32 %v1400_v36  ;;  %v2057_v36 = vld [vmem:[%s3878_s3 + $0xe8] sm:$0xff] }
 0x39e   :  { %v1403_v37 = vpop.xlane.xlu0 %1402  ;;  %v1877_v41 = vpop.permute.xlu1 %1876 }
 0x39f   :  { %3327 = vrcp.f32 %v1403_v37 }
 0x3a1   :  { %v3322_v38 = vpop.eup %3321 }
 0x3a2   :  { %v1416_v40 = vmul.f32 %v3322_v38, %v3306_v15  ;;  %v1801_v42 = vpop.permute.xlu0 %1800  ;;  %v1953_v52 = vpop.permute.xlu1 %1952 }
 0x3a3   :  { %3093 = vmatpush3.msra.mxu1 %v1801_v42  ;;  %v2055_v42 = vld [vmem:[%s3878_s3 + $0xd8] sm:$0xff] }
 0x3a4   :  { %3090 = vmatmul.mubr.msk.f32.vlgmr.msra.gmra.mrb[20].mxu0 %vm1331_vm4, %v1416_v40  ;;  %3102 = vmatprep.subr.mxu1 %v3355_v8  ;;  %v3284_v40 = vpack.c.bf16 %v2057_v36, %v2056_v34 }
 0x3a5   :  { %v3324_v44 = vpop.eup %3323  ;;  %3098 = vmatpush3.msra.mxu0 %v1877_v41  ;;  %3099 = vmatprep.mubr.msk.f32.mxu0 %vm3354_vm2, %v3355_v8  ;;  %v2054_v41 = vld [vmem:[%s3878_s3 + $0xd0] sm:$0xff] }
 0x3a6   :  { %v3326_v48 = vpop.eup %3325  ;;  %v1417_v49 = vmul.f32 %v3324_v44, %v3629_v16  ;;  %3227 = vmatprep.subr.bf16.mxu0 %v3353_v3  ;;  %v3248_v16 = vpack.c.bf16 %v2039_v13, %v2038_v12 }
 0x3a7   :  { %v1418_v51 = vmul.f32 %v3326_v48, %v3632_v43  ;;  %v2043_v43 = vld [vmem:[%s3878_s3 + $0x78] sm:$0xff] }
 0x3a8   :  { %3095 = vmatmul.mubr.msk.f32.vlgmr.msra.gmra.mrb[20].mxu1 %vm1331_vm4, %v1417_v49  ;;  %v3280_v49 = vpack.c.bf16 %v2055_v42, %v2054_v41 }
 0x3a9   :  { %v3328_v54 = vpop.eup %3327  ;;  %3100 = vmatmul.mubr.msk.f32.vlgmr.msra.gmra.mrb[22].mxu0 %vm1331_vm4, %v1418_v51  ;;  %3103 = vmatpush3.msra.mxu1 %v1953_v52  ;;  %v2058_v51 = vld [vmem:[%s3878_s3 + $0xf0] sm:$0xff]  ;;  %v2059_v52 = vld [vmem:[%s3878_s3 + $0xf8] sm:$0xff] }
 0x3aa   :  { %v1419_v35 = vmul.f32 %v3328_v54, %v3638_v19  ;;  %3104 = vmatprep.mubr.msk.f32.mxu1 %vm3354_vm2, %v3355_v8  ;;  %3235 = vmatprep.subr.bf16.mxu1 %v3353_v3  ;;  %v3256_v19 = vpack.c.bf16 %v2043_v43, %v2042_v47  ;;  %v3288_v57 = vpack.c.bf16 %v2059_v52, %v2058_v51 }
 0x3ab   :  { %3115 = vmatprep.mubr.msk.f32.mxu0 %vm3354_vm2, %v3355_v8 }
 0x3ac   :  { %3105 = vmatmul.mubr.msk.f32.vlgmr.msra.gmra.mrb[22].mxu1 %vm1331_vm4, %v1419_v35  ;;  %3230 = vmatpush3.bf16.xpose.msk.msra.mxu0 %vm3682_vm5, %v3228_v53 }
 0x3ad   :  { %3231 = vmatprep.subr.bf16.mxu0 %v3353_v3  ;;  %3126 = vmatprep.mubr.msk.f32.mxu1 %vm3354_vm2, %v3355_v8 }
 0x3b0   :  { %3238 = vmatpush3.bf16.xpose.msk.msra.mxu1 %vm3682_vm5, %v3236_v59 }
 0x3b1   :  { %3239 = vmatprep.subr.bf16.mxu1 %v3353_v3 }
 0x3b4   :  { %3234 = vmatpush3.bf16.xpose.msk.msra.mxu0 %vm3682_vm5, %v3232_v62 }
 0x3b5   :  { %3243 = vmatprep.subr.bf16.mxu0 %v3353_v3 }
 0x3b8   :  { %3242 = vmatpush3.bf16.xpose.msk.msra.mxu1 %vm3682_vm5, %v3240_v1 }
 0x3b9   :  { %3251 = vmatprep.subr.bf16.mxu1 %v3353_v3 }
 0x43a   :  { %v1492_v9 = vpop.f32.mrb[16].mxu0 }
 0x43b   :  { %v3071_v10 = vpop.f32.mrb[17].mxu0  ;;  %3116 = vmatmul.mubr.msk.f32.vlgmr.msra.gmra.mrb[24].mxu0 %vm709_vm3, %v1492_v9 }
 0x43c   :  { %3246 = vmatpush3.bf16.xpose.msk.msra.mxu0 %vm3682_vm5, %v3244_v5  ;;  %3137 = vmatprep.mubr.msk.f32.mxu0 %vm3354_vm2, %v3355_v8 }
 0x43d   :  { %3247 = vmatprep.subr.bf16.mxu0 %v3353_v3 }
 0x43e   :  { %v1568_v14 = vpop.f32.mrb[16].mxu1 }
 0x43f   :  { %v3076_v15 = vpop.f32.mrb[17].mxu1  ;;  %3127 = vmatmul.mubr.msk.f32.vlgmr.msra.gmra.mrb[24].mxu1 %vm709_vm3, %v1568_v14 }
 0x440   :  { %3254 = vmatpush3.bf16.xpose.msk.msra.mxu1 %vm3682_vm5, %v3252_v11  ;;  %3148 = vmatprep.mubr.msk.f32.mxu1 %vm3354_vm2, %v3355_v8 }
 0x441   :  { %3255 = vmatprep.subr.bf16.mxu1 %v3353_v3 }
 0x442   :  { %v1644_v17 = vpop.f32.mrb[18].mxu0 }
 0x443   :  { %v3081_v18 = vpop.f32.mrb[19].mxu0 }
 0x444   :  { %3250 = vmatpush3.bf16.xpose.msk.msra.mxu0 %vm3682_vm5, %v3248_v16 }
 0x445   :  { %3259 = vmatprep.subr.bf16.mxu0 %v3353_v3 }
 0x446   :  { %v1720_v22 = vpop.f32.mrb[18].mxu1 }
 0x447   :  { %v3086_v23 = vpop.f32.mrb[19].mxu1 }
 0x448   :  { %3258 = vmatpush3.bf16.xpose.msk.msra.mxu1 %vm3682_vm5, %v3256_v19  ;;  %v2874_v19 = vld [vmem:[%s3879_s4] ss:$0 sm:$0xff] }
 0x449   :  { %3267 = vmatprep.subr.bf16.mxu1 %v3353_v3 }
 0x44b   :  { %3138 = vmatmul.mubr.msk.f32.vlgmr.msra.gmra.mrb[26].mxu0 %vm709_vm3, %v1644_v17 }
 0x44c   :  { %3262 = vmatpush3.bf16.xpose.msk.msra.mxu0 %vm3682_vm5, %v3260_v24  ;;  %3159 = vmatprep.mubr.msk.f32.mxu0 %vm3354_vm2, %v3355_v8 }
 0x44d   :  { %3263 = vmatprep.subr.bf16.mxu0 %v3353_v3 }
 0x44f   :  { %3149 = vmatmul.mubr.msk.f32.vlgmr.msra.gmra.mrb[26].mxu1 %vm709_vm3, %v1720_v22 }
 0x450   :  { %3270 = vmatpush3.bf16.xpose.msk.msra.mxu1 %vm3682_vm5, %v3268_v27  ;;  %3170 = vmatprep.mubr.msk.f32.mxu1 %vm3354_vm2, %v3355_v8 }
 0x451   :  { %3271 = vmatprep.subr.bf16.mxu1 %v3353_v3 }
 0x454   :  { %3266 = vmatpush3.bf16.xpose.msk.msra.mxu0 %vm3682_vm5, %v3264_v50 }
 0x455   :  { %3275 = vmatprep.subr.bf16.mxu0 %v3353_v3 }
 0x458   :  { %3274 = vmatpush3.bf16.xpose.msk.msra.mxu1 %vm3682_vm5, %v3272_v30 }
 0x459   :  { %3283 = vmatprep.subr.bf16.mxu1 %v3353_v3 }
 0x477   :  { %v1796_v37 = vpop.f32.mrb[20].mxu0 }
 0x478   :  { %v3091_v38 = vpop.f32.mrb[21].mxu0  ;;  %3160 = vmatmul.mubr.msk.f32.vlgmr.msra.gmra.mrb[28].mxu0 %vm709_vm3, %v1796_v37 }
 0x479   :  { %3278 = vmatpush3.bf16.xpose.msk.msra.mxu0 %vm3682_vm5, %v3276_v33  ;;  %3181 = vmatprep.mubr.msk.f32.mxu0 %vm3354_vm2, %v3355_v8 }
 0x47a   :  { %3279 = vmatprep.subr.bf16.mxu0 %v3353_v3 }
 0x47b   :  { %v1872_v44 = vpop.f32.mrb[20].mxu1 }
 0x47c   :  { %v1948_v45 = vpop.f32.mrb[22].mxu0  ;;  %v3096_v46 = vpop.f32.mrb[21].mxu1  ;;  %3171 = vmatmul.mubr.msk.f32.vlgmr.msra.gmra.mrb[28].mxu1 %vm709_vm3, %v1872_v44 }
 0x47d   :  { %v3101_v48 = vpop.f32.mrb[23].mxu0  ;;  %3286 = vmatpush3.bf16.xpose.msk.msra.mxu1 %vm3682_vm5, %v3284_v40  ;;  %3192 = vmatprep.mubr.msk.f32.mxu1 %vm3354_vm2, %v3355_v8 }
 0x47e   :  { %3287 = vmatprep.subr.bf16.mxu1 %v3353_v3 }
 0x47f   :  { %v2024_v53 = vpop.f32.mrb[22].mxu1 }
 0x480   :  { %v3106_v54 = vpop.f32.mrb[23].mxu1 }
 0x481   :  { %3282 = vmatpush3.bf16.xpose.msk.msra.mxu0 %vm3682_vm5, %v3280_v49 }
 0x485   :  { %3290 = vmatpush3.bf16.xpose.msk.msra.mxu1 %vm3682_vm5, %v3288_v57 }
 0x488   :  { %3182 = vmatmul.mubr.msk.f32.vlgmr.msra.gmra.mrb[30].mxu0 %vm709_vm3, %v1948_v45 }
 0x48c   :  { %3193 = vmatmul.mubr.msk.f32.vlgmr.msra.gmra.mrb[30].mxu1 %vm709_vm3, %v2024_v53 }
 0x50e   :  { %v2141_v3 = vpop.f32.mrb[24].mxu0 }
 0x50f   :  { %v3117_v8 = vpop.f32.mrb[25].mxu0  ;;  %v2740_v35 = vsel %vm94_vm0, %v2141_v3, 0.0 }
 0x512   :  { %v2226_v39 = vpop.f32.mrb[24].mxu1 }
 0x513   :  { %v2741_v59 = vsel %vm94_vm0, %v2226_v39, 0.0  ;;  %v3128_v60 = vpop.f32.mrb[25].mxu1 }
 0x514   :  { %v2742_v61 = vadd.f32 %v2741_v59, %v2740_v35 }
 0x51e   :  { %v2311_v62 = vpop.f32.mrb[26].mxu0 }
 0x51f   :  { %v2743_v63 = vsel %vm94_vm0, %v2311_v62, 0.0  ;;  %v3139_v0 = vpop.f32.mrb[27].mxu0 }
 0x520   :  { %v2744_v1 = vadd.f32 %v2743_v63, %v2742_v61 }
 0x522   :  { %v2396_v56 = vpop.f32.mrb[26].mxu1 }
 0x523   :  { %v2745_v2 = vsel %vm94_vm0, %v2396_v56, 0.0  ;;  %v3150_v4 = vpop.f32.mrb[27].mxu1 }
 0x524   :  { %v2746_v5 = vadd.f32 %v2745_v2, %v2744_v1 }
 0x54b   :  { %v2481_v6 = vpop.f32.mrb[28].mxu0 }
 0x54c   :  { %v2747_v7 = vsel %vm94_vm0, %v2481_v6, 0.0  ;;  %v3161_v9 = vpop.f32.mrb[29].mxu0 }
 0x54d   :  { %v2748_v10 = vadd.f32 %v2747_v7, %v2746_v5 }
 0x54f   :  { %v2566_v11 = vpop.f32.mrb[28].mxu1 }
 0x550   :  { %v2749_v12 = vsel %vm94_vm0, %v2566_v11, 0.0  ;;  %v3172_v13 = vpop.f32.mrb[29].mxu1 }
 0x551   :  { %v2750_v14 = vadd.f32 %v2749_v12, %v2748_v10 }
 0x55b   :  { %v2651_v15 = vpop.f32.mrb[30].mxu0 }
 0x55c   :  { %v2751_v16 = vsel %vm94_vm0, %v2651_v15, 0.0  ;;  %v3183_v47 = vpop.f32.mrb[31].mxu0 }
 0x55d   :  { %v2752_v43 = vadd.f32 %v2751_v16, %v2750_v14 }
 0x55f   :  { %v2736_v17 = vpop.f32.mrb[30].mxu1 }
 0x560   :  { %v2753_v18 = vsel %vm94_vm0, %v2736_v17, 0.0  ;;  %v3194_v20 = vpop.f32.mrb[31].mxu1 }
 0x561   :  { %v2754_v21 = vadd.f32 %v2753_v18, %v2752_v43 }
 0x563   :  { %v2762_v22 = vadd.f32 %v2874_v19, %v2754_v21 }
 0x565   :  { %2763 = vst.msk [vmem:[#allocation2] sm:$0xff] %vm94_vm0, %v2762_v22 }
 0x566   :  { %3340 = shalt.err (!%p3337_p4)
}
 0x567   :  { %s3341_s29 = scalar_lea.hbm %s3880_s5, 128 }
 0x568   :  { %p3342_p5 = scmp.ne.s32.totalorder %s3880_s5, %s3341_s29  ;;  %p3345_p6 = scmp.lt.u32.totalorder %s3341_s29, %s3880_s5 }
 0x56a   :  { %p3347_p7 = pnand %p3345_p6, %p3342_p5 }
 0x56c   :  { %3350 = shalt.err (!%p3347_p7)
}
 0x56d   :  { %2773 = dma.vmem_to_hbm [thread:$0]  %s2771_s1, 128, %s3880_s5, [#allocation3]  }
 0x56e   :  { %3351 = dma.done.wait [#allocation3], 128  }
 0x56f   :  { %3352 = vsyncadd [#allocation3], 4294967168 }
 0x570   :  { %2777 = vsyncpa [#allocation3], 1 }

</bundles_post_ra>
